<compile_context>
chip_gen: v5e
topology: v5e:2x2
jax: 0.10.0
libtpu: 0.0.40
codegen_flags: <defaults>
</compile_context>

<pallas_src>
import math
from functools import partial

import jax
import jax.numpy as jnp
from jax.experimental import pallas as pl
from jax.experimental.pallas import tpu as pltpu

EPS = 1e-12  # torch.nn.functional.normalize default eps


# --------------------------------------------------------------------------- #
# Stage 1: cond vector -> (B, D_io) projection.  Runs ONCE per forward.
# --------------------------------------------------------------------------- #
def _cond_proj_kernel(c_ref, w_ref, b_ref, o_ref):
    # c_ref: (B, D_c), w_ref: (D_c, D_io), b_ref: (1, D_io), o_ref: (B, D_io) f32
    c = c_ref[...].astype(jnp.float32)
    norm = jnp.sqrt(jnp.sum(c * c, axis=-1, keepdims=True))
    c_n = c / jnp.maximum(norm, EPS)
    proj = jnp.dot(c_n, w_ref[...].astype(jnp.float32),
                   preferred_element_type=jnp.float32)
    o_ref[...] = proj + b_ref[...].astype(jnp.float32)


def _cond_projection(cond_vec, wc, bias):
    B, D_c = cond_vec.shape
    D_io = wc.shape[1]
    return pl.pallas_call(
        _cond_proj_kernel,
        out_shape=jax.ShapeDtypeStruct((B, D_io), jnp.float32),
        grid_spec=pltpu.PrefetchScalarGridSpec(
            num_scalar_prefetch=0,
            grid=(1,),
            in_specs=[
                pl.BlockSpec((B, D_c), lambda i: (0, 0)),
                pl.BlockSpec((D_c, D_io), lambda i: (0, 0)),
                pl.BlockSpec((1, D_io), lambda i: (0, 0)),
            ],
            out_specs=pl.BlockSpec((B, D_io), lambda i: (0, 0)),
        ),
    )(cond_vec, wc, bias.reshape(1, D_io))


# --------------------------------------------------------------------------- #
# Stage 2a: add mode — lane-dense broadcast add (HBM-roofline bound).
# --------------------------------------------------------------------------- #
def _add_kernel(x_ref, p_ref, o_ref):
    # x_ref: (1, rt, L), p_ref: (1, 1, L) f32 (lane-tiled proj), o_ref: (1, rt, L)
    o_ref[...] = x_ref[...] + p_ref[...].astype(o_ref.dtype)


# --------------------------------------------------------------------------- #
# Stage 2b: concat mode — one big MXU matmul per tile + broadcast add of proj.
# --------------------------------------------------------------------------- #
def _concat_kernel(x_ref, w_ref, p_ref, o_ref):
    # x_ref: (1, tt, D_io), w_ref: (D_io, D_io), p_ref: (1, 1, D_io) f32
    acc = jnp.dot(x_ref[0], w_ref[...], preferred_element_type=jnp.float32)
    o_ref[0] = (acc + p_ref[0]).astype(o_ref.dtype)


# --------------------------------------------------------------------------- #
# Tiling helpers (all on static shapes, evaluated at trace time).
# --------------------------------------------------------------------------- #
def _pick_tile(n, bytes_per_row, sub_mult, target_bytes=2 << 20):
    """Largest divisor of n whose block stays under target_bytes and honors the
    sublane rule (tile % sub_mult == 0 or tile == n)."""
    divs = [d for d in range(1, n + 1) if n % d == 0]
    legal = [d for d in divs if d % sub_mult == 0 or d == n]
    under = [d for d in legal if d * bytes_per_row <= target_bytes]
    if under:
        return max(under)
    return min(legal)  # non-empty: n itself is always legal


def _lane_merge_factor(T, D_io):
    """Merge g time steps into the lane dim so g*D_io is a multiple of 128
    (unmasked stores), widened toward ~1024 lanes while g still divides T."""
    base = 128 // math.gcd(D_io, 128)
    if T % base != 0:
        return 1  # fallback: keep (T, D_io) layout (still correct, just masked stores)
    g = base
    while T % (2 * g) == 0 and 2 * g * D_io <= 1024:
        g *= 2
    return g


def _apply_add(i_series, proj):
    B, T, D_io = i_series.shape
    itemsize = jnp.dtype(i_series.dtype).itemsize
    sub_mult = 16 if itemsize == 2 else 8

    g = _lane_merge_factor(T, D_io)
    rows, L = T // g, g * D_io
    rt = _pick_tile(rows, L * itemsize, sub_mult)

    x2 = i_series.reshape(B, rows, L)                 # free row-major reshape
    p2 = jnp.tile(proj, (1, g)).reshape(B, 1, L)      # proj repeated along lanes

    out = pl.pallas_call(
        _add_kernel,
        out_shape=jax.ShapeDtypeStruct((B, rows, L), i_series.dtype),
        grid_spec=pltpu.PrefetchScalarGridSpec(
            num_scalar_prefetch=0,
            grid=(B, rows // rt),
            in_specs=[
                pl.BlockSpec((1, rt, L), lambda b, t: (b, t, 0)),
                # constant per-batch block: Pallas elides the re-copy across t steps
                pl.BlockSpec((1, 1, L), lambda b, t: (b, 0, 0)),
            ],
            out_specs=pl.BlockSpec((1, rt, L), lambda b, t: (b, t, 0)),
        ),
        compiler_params=pltpu.CompilerParams(
            dimension_semantics=("parallel", "parallel")),
    )(x2, p2)
    return out.reshape(B, T, D_io)


def _apply_concat(i_series, proj, wx):
    B, T, D_io = i_series.shape
    itemsize = jnp.dtype(i_series.dtype).itemsize
    sub_mult = 16 if itemsize == 2 else 8

    tt = _pick_tile(T, D_io * itemsize, sub_mult)
    proj3 = proj[:, None, :]  # (B, 1, D_io) f32

    return pl.pallas_call(
        _concat_kernel,
        out_shape=jax.ShapeDtypeStruct((B, T, D_io), i_series.dtype),
        grid_spec=pltpu.PrefetchScalarGridSpec(
            num_scalar_prefetch=0,
            grid=(B, T // tt),
            in_specs=[
                pl.BlockSpec((1, tt, D_io), lambda b, t: (b, t, 0)),
                # constant block index -> no per-step re-copy of the weight
                pl.BlockSpec((D_io, D_io), lambda b, t: (0, 0)),
                pl.BlockSpec((1, 1, D_io), lambda b, t: (b, 0, 0)),
            ],
            out_specs=pl.BlockSpec((1, tt, D_io), lambda b, t: (b, t, 0)),
        ),
        compiler_params=pltpu.CompilerParams(
            dimension_semantics=("parallel", "parallel")),
    )(i_series, wx, proj3)


# --------------------------------------------------------------------------- #
# Parameter prep (once, at load time) + jitted forward.
# --------------------------------------------------------------------------- #
def prepare_global_cond_params(weight, bias, integration_type, dim_io):
    """weight: (dim_io, dim_integrated) torch nn.Linear layout; transpose/split once."""
    w_t = jnp.asarray(weight).T
    b = jnp.asarray(bias)
    if integration_type == "add":
        assert w_t.shape == (dim_io, dim_io), "add mode requires dim_global_cond == dim_io"
        return {"wc": w_t, "bias": b}
    if integration_type == "concat":
        return {"wx": w_t[:dim_io], "wc": w_t[dim_io:], "bias": b}
    raise ValueError(f"Integration type '{integration_type}' is not supported.")


@partial(jax.jit, static_argnames=("integration_type",))
def global_cond_net(i_series, cond_vec, params, integration_type):
    # (B, D_io) f32 projection of the normalized cond vector, computed once.
    proj = _cond_projection(cond_vec, params["wc"], params["bias"])
    if integration_type == "add":
        return _apply_add(i_series, proj)
    if integration_type == "concat":
        return _apply_concat(i_series, proj, params["wx"])
    raise ValueError(f"Integration type '{integration_type}' is not supported.")


# --------------------------------------------------------------------------- #
# Pure-JAX reference + self-check.
# --------------------------------------------------------------------------- #
def _reference(i_series, cond_vec, weight, bias, integration_type):
    norm = jnp.linalg.norm(cond_vec, axis=-1, keepdims=True)
    c_n = cond_vec / jnp.maximum(norm, EPS)
    if integration_type == "add":
        return i_series + (c_n @ weight.T + bias)[:, None, :]
    B, T, _ = i_series.shape
    cs = jnp.broadcast_to(c_n[:, None, :], (B, T, cond_vec.shape[1]))
    cat = jnp.concatenate([i_series, cs], axis=-1)
    return cat @ weight.T + bias


if __name__ == "__main__":
    key = jax.random.PRNGKey(0)
    B, T, D_io = 2, 64, 32
    D_c_add, D_c_cat = 32, 48

    k1, k2, k3, k4, k5, k6, k7 = jax.random.split(key, 7)
    i_series = jax.random.normal(k1, (B, T, D_io), dtype=jnp.float32)
    cond_add = jax.random.normal(k2, (B, D_c_add), dtype=jnp.float32)
    cond_cat = jax.random.normal(k3, (B, D_c_cat), dtype=jnp.float32)

    # add-mode params: Linear(D_io -> D_io)
    w_add = jax.random.normal(k4, (D_io, D_io), dtype=jnp.float32) * 0.1
    b_add = jax.random.normal(k5, (D_io,), dtype=jnp.float32) * 0.1
    # concat-mode params: Linear(D_io + D_c -> D_io)
    w_cat = jax.random.normal(k6, (D_io, D_io + D_c_cat), dtype=jnp.float32) * 0.1
    b_cat = jax.random.normal(k7, (D_io,), dtype=jnp.float32) * 0.1

    p_add = prepare_global_cond_params(w_add, b_add, "add", D_io)
    p_cat = prepare_global_cond_params(w_cat, b_cat, "concat", D_io)

    out_add = global_cond_net(i_series, cond_add, p_add, "add")
    out_cat = global_cond_net(i_series, cond_cat, p_cat, "concat")
    jax.block_until_ready(out_add)
    jax.block_until_ready(out_cat)

    ref_add = _reference(i_series, cond_add, w_add, b_add, "add")
    ref_cat = _reference(i_series, cond_cat, w_cat, b_cat, "concat")

    assert out_add.shape == (B, T, D_io) and out_cat.shape == (B, T, D_io)
    assert jnp.allclose(out_add, ref_add, atol=1e-5, rtol=1e-5)
    assert jnp.allclose(out_cat, ref_cat, atol=1e-5, rtol=1e-5)

    print("KERNEL_OK")
</pallas_src>

<mosaic_0001>
module attributes {stable_mosaic.version = 11 : i64} {
  func.func @_cond_proj_kernel(%arg0: i32, %arg1: memref<2x32xf32, #tpu.memory_space<vmem>>, %arg2: memref<32x32xf32, #tpu.memory_space<vmem>>, %arg3: memref<1x32xf32, #tpu.memory_space<vmem>>, %arg4: memref<2x32xf32, #tpu.memory_space<vmem>>) attributes {dimension_semantics = [#tpu.dimension_semantics<arbitrary>], iteration_bounds = array<i64: 1>, scalar_prefetch = 0 : i64, scratch_operands = 0 : i64, tpu.core_type = #tpu.core_type<tc>, window_params = [{pipeline_mode = #tpu.pipeline_mode<synchronous>, transform_indices = @transform_0, window_bounds = array<i64: 2, 32>}, {pipeline_mode = #tpu.pipeline_mode<synchronous>, transform_indices = @transform_1, window_bounds = array<i64: 32, 32>}, {pipeline_mode = #tpu.pipeline_mode<synchronous>, transform_indices = @transform_2, window_bounds = array<i64: 1, 32>}, {pipeline_mode = #tpu.pipeline_mode<synchronous>, transform_indices = @transform_3, window_bounds = array<i64: 2, 32>}]} {
    %c0 = arith.constant 0 : index
    %c0_0 = arith.constant 0 : index
    %0 = vector.load %arg1[%c0, %c0_0] : memref<2x32xf32, #tpu.memory_space<vmem>>, vector<2x32xf32>
    %1 = arith.mulf %0, %0 : vector<2x32xf32>
    %cst = arith.constant dense<0.000000e+00> : vector<2xf32>
    %2 = vector.multi_reduction <add>, %1, %cst [1] : vector<2x32xf32> to vector<2xf32>
    %3 = vector.shape_cast %2 : vector<2xf32> to vector<2x1xf32>
    %4 = math.sqrt %3 : vector<2x1xf32>
    %cst_1 = arith.constant 9.99999996E-13 : f32
    %5 = vector.broadcast %cst_1 : f32 to vector<2x1xf32>
    %6 = arith.maximumf %4, %5 : vector<2x1xf32>
    %7 = vector.broadcast %6 : vector<2x1xf32> to vector<2x32xf32>
    %8 = arith.divf %0, %7 : vector<2x32xf32>
    %c0_2 = arith.constant 0 : index
    %c0_3 = arith.constant 0 : index
    %9 = vector.load %arg2[%c0_2, %c0_3] : memref<32x32xf32, #tpu.memory_space<vmem>>, vector<32x32xf32>
    %cst_4 = arith.constant dense<0.000000e+00> : vector<2x32xf32>
    %10 = tpu.matmul %8, %9, %cst_4 {dimension_numbers = #tpu.dot_dimension_numbers<[1], [0], [0], [1], [0, 0, 1, 1], [], []>} : vector<2x32xf32>, vector<32x32xf32>, vector<2x32xf32> -> vector<2x32xf32>
    %c0_5 = arith.constant 0 : index
    %c0_6 = arith.constant 0 : index
    %11 = vector.load %arg3[%c0_5, %c0_6] : memref<1x32xf32, #tpu.memory_space<vmem>>, vector<1x32xf32>
    %12 = vector.broadcast %11 : vector<1x32xf32> to vector<2x32xf32>
    %13 = arith.addf %10, %12 : vector<2x32xf32>
    %c0_7 = arith.constant 0 : index
    %c0_8 = arith.constant 0 : index
    %14 = vector.load %arg4[%c0_7, %c0_8] : memref<2x32xf32, #tpu.memory_space<vmem>>, vector<2x32xf32>
    tpu.vector_store %arg4[%c0_7, %c0_8], %13 {strides = array<i32>} : memref<2x32xf32, #tpu.memory_space<vmem>>, vector<2x32xf32>,
    return
  }
  func.func @transform_0(%arg0: i32) -> (i32, i32) {
    %c0_i32 = arith.constant 0 : i32
    %c0_i32_0 = arith.constant 0 : i32
    %c0_i32_1 = arith.constant 0 : i32
    return %c0_i32, %c0_i32_0 : i32, i32
  }
  func.func @transform_1(%arg0: i32) -> (i32, i32) {
    %c0_i32 = arith.constant 0 : i32
    %c0_i32_0 = arith.constant 0 : i32
    %c0_i32_1 = arith.constant 0 : i32
    return %c0_i32, %c0_i32_0 : i32, i32
  }
  func.func @transform_2(%arg0: i32) -> (i32, i32) {
    %c0_i32 = arith.constant 0 : i32
    %c0_i32_0 = arith.constant 0 : i32
    %c0_i32_1 = arith.constant 0 : i32
    return %c0_i32, %c0_i32_0 : i32, i32
  }
  func.func @transform_3(%arg0: i32) -> (i32, i32) {
    %c0_i32 = arith.constant 0 : i32
    %c0_i32_0 = arith.constant 0 : i32
    %c0_i32_1 = arith.constant 0 : i32
    return %c0_i32, %c0_i32_0 : i32, i32
  }
}

module attributes {stable_mosaic.version = 11 : i64} {
  func.func @_add_kernel(%arg0: i32, %arg1: i32, %arg2: memref<1x2x1024xf32, #tpu.memory_space<vmem>>, %arg3: memref<1x1x1024xf32, #tpu.memory_space<vmem>>, %arg4: memref<1x2x1024xf32, #tpu.memory_space<vmem>>) attributes {dimension_semantics = [#tpu.dimension_semantics<parallel>, #tpu.dimension_semantics<parallel>], iteration_bounds = array<i64: 2, 1>, scalar_prefetch = 0 : i64, scratch_operands = 0 : i64, tpu.core_type = #tpu.core_type<tc>, window_params = [{transform_indices = @transform_0, window_bounds = array<i64: 1, 2, 1024>}, {transform_indices = @transform_1, window_bounds = array<i64: 1, 1, 1024>}, {transform_indices = @transform_2, window_bounds = array<i64: 1, 2, 1024>}]} {
    %c0 = arith.constant 0 : index
    %c0_0 = arith.constant 0 : index
    %c0_1 = arith.constant 0 : index
    %0 = vector.load %arg2[%c0, %c0_0, %c0_1] : memref<1x2x1024xf32, #tpu.memory_space<vmem>>, vector<1x2x1024xf32>
    %c0_2 = arith.constant 0 : index
    %c0_3 = arith.constant 0 : index
    %c0_4 = arith.constant 0 : index
    %1 = vector.load %arg3[%c0_2, %c0_3, %c0_4] : memref<1x1x1024xf32, #tpu.memory_space<vmem>>, vector<1x1x1024xf32>
    %2 = vector.broadcast %1 : vector<1x1x1024xf32> to vector<1x2x1024xf32>
    %3 = arith.addf %0, %2 : vector<1x2x1024xf32>
    %c0_5 = arith.constant 0 : index
    %c0_6 = arith.constant 0 : index
    %c0_7 = arith.constant 0 : index
    %4 = vector.load %arg4[%c0_5, %c0_6, %c0_7] : memref<1x2x1024xf32, #tpu.memory_space<vmem>>, vector<1x2x1024xf32>
    tpu.vector_store %arg4[%c0_5, %c0_6, %c0_7], %3 {strides = array<i32>} : memref<1x2x1024xf32, #tpu.memory_space<vmem>>, vector<1x2x1024xf32>,
    return
  }
  func.func @transform_0(%arg0: i32, %arg1: i32) -> (i32, i32, i32) {
    %c0_i32 = arith.constant 0 : i32
    %c0_i32_0 = arith.constant 0 : i32
    return %arg0, %arg1, %c0_i32 : i32, i32, i32
  }
  func.func @transform_1(%arg0: i32, %arg1: i32) -> (i32, i32, i32) {
    %c0_i32 = arith.constant 0 : i32
    %c0_i32_0 = arith.constant 0 : i32
    %c0_i32_1 = arith.constant 0 : i32
    return %arg0, %c0_i32, %c0_i32_0 : i32, i32, i32
  }
  func.func @transform_2(%arg0: i32, %arg1: i32) -> (i32, i32, i32) {
    %c0_i32 = arith.constant 0 : i32
    %c0_i32_0 = arith.constant 0 : i32
    return %arg0, %arg1, %c0_i32 : i32, i32, i32
  }
}

</mosaic_0001>

<bundles_post_ra>
// kernel: global_cond_net.3
= control target key start
LH: loop header
LB: loop body
LE: loop exit
PB: predicated region body
PF: predicated region fallthrough
CT: control target
= control target key end

     0   :  { %s411_s9 = smov 0   ;;  %s413_s10 = smov 0   ;;  %s451_s0 = inlined_call_operand.vmem [shape: f32[2,2,1024], index: 0, kind: input, shape index: {}]   ;;  %s452_s1 = inlined_call_operand.vmem [shape: f32[2,1,1024], index: 1, kind: input, shape index: {}]   ;;  %s453_s2 = inlined_call_operand.vmem [shape: f32[2,2,1024], index: 2, kind: output, shape index: {}]  }
   0x1   :  { %s415_s11 = smov 0  }
   0x2 LB: > { %s24_s12 = sadd.s32 1, %s390_s10  ;;  %p338_p0 = scmp.ge.s32.totalorder %s394_s11, 1  ;;  %s394_s11 = sphi %s415_s11, %s12_s11   ;;  %s390_s10 = sphi %s413_s10, %s455_s10   ;;  %s386_s9 = sphi %s411_s9, %s454_s9  }
   0x3   : > { %p26_p1 = scmp.ge.s32.totalorder %s24_s12, 2  ;;  %p141_p2 = scmp.lt.s32.totalorder %s394_s11, 3 }
   0x5   : > { %s457_s12 = smov (%p26_p1, %s24_s12), 0  ;;  %p142_p3 = pnand %p338_p0, %p141_p2 }
   0x6   : > { %p175_p4 = scmp.lt.s32.totalorder (!%p142_p3), %s386_s9, 1 }
   0x7   : > { %145 = sbr.rel (%p142_p3) target bundleno = 26 (0x1a), region = 28 }
   0xc   : > { %s459_s9 = smov (!%p175_p4, %s386_s9), 1  ;;  %vm215_vm0 = vcmask 1041408   ;;  %vm217_vm1 = vcmask 1045508   ;;  %vm219_vm2 = vcmask 1043456  }
   0xd   : > { %s346_s13 = sshll.u32 %s459_s9, 4  ;;  %s341_s14 = sshll.u32 %s459_s9, 3 }
   0xe   : > { %s187_s17 = scalar_lea.vmem %s452_s1, %s341_s14  ;;  %s183_s20 = scalar_lea.vmem %s451_s0, %s346_s13 }
   0xf   : > { %v199_v0 = vld [vmem:[%s187_s17] sm:$0xff]  ;;  %v198_v18 = vld [vmem:[%s183_s20 + $0x8] sm:$0xff]  ;;  %s196_s23 = scalar_lea.vmem %s453_s2, %s346_s13 }
  0x10   : > { %v201_v1 = vperm.slane %v199_v0, 0  ;;  %v202_v2 = vperm.slane %v199_v0, 1  ;;  %v203_v3 = vperm.slane %v199_v0, 2  ;;  %v204_v4 = vperm.slane %v199_v0, 3  ;;  %v197_v12 = vld [vmem:[%s183_s20] sm:$0xff] }
  0x11   : > { %v205_v5 = vperm.slane %v199_v0, 4  ;;  %v206_v6 = vperm.slane %v199_v0, 5  ;;  %v207_v7 = vperm.slane %v199_v0, 6  ;;  %v208_v8 = vperm.slane %v199_v0, 7 }
  0x12   : > { %v209_v9 = vrot.slane %v202_v2, 6  ;;  %v210_v10 = vrot.slane %v203_v3, 4  ;;  %v211_v11 = vrot.slane %v204_v4, 2 }
  0x13   : > { %v212_v13 = vrot.slane %v206_v6, 6  ;;  %v213_v14 = vrot.slane %v207_v7, 4  ;;  %v214_v15 = vrot.slane %v208_v8, 2 }
  0x14   : > { %v216_v16 = vsel %vm215_vm0, %v201_v1, %v209_v9  ;;  %v218_v17 = vsel %vm217_vm1, %v210_v10, %v211_v11 }
  0x15   : > { %v220_v19 = vsel %vm219_vm2, %v216_v16, %v218_v17  ;;  %v221_v20 = vsel %vm215_vm0, %v205_v5, %v212_v13  ;;  %v222_v21 = vsel %vm217_vm1, %v213_v14, %v214_v15 }
  0x16   : > { %v226_v22 = vadd.f32 %v220_v19, %v197_v12  ;;  %v223_v23 = vsel %vm219_vm2, %v221_v20, %v222_v21 }
  0x17   : > { %v227_v24 = vadd.f32 %v223_v23, %v198_v18 }
  0x18   : > { %228 = vst [vmem:[%s196_s23] sm:$0xff] %v226_v22 }
  0x19   : > { %229 = vst [vmem:[%s196_s23 + $0x8] sm:$0xff] %v227_v24 }
  0x1a PF: > { %s12_s11 = sadd.s32 1, %s394_s11   ;;  %s454_s9 = smov %s390_s10 }
  0x1b   : > { %p9_p5 = scmp.ge.s32.totalorder %s12_s11, 4   ;;  %s455_s10 = smov %s457_s12 }
  0x1d   :  { %11 = sbr.rel (!%p9_p5) target bundleno = 2 (0x2), region = 61 }

// kernel: global_cond_net.2
= control target key start
LH: loop header
LB: loop body
LE: loop exit
PB: predicated region body
PF: predicated region fallthrough
CT: control target
= control target key end

     0   :  { %8 = vsyncpa [#allocation3], 0  ;;  %s217_s0 = inlined_call_operand.hbm [shape: f32[2,32], index: 0, kind: input, shape index: {}]   ;;  %s218_s1 = inlined_call_operand.hbm [shape: f32[32,32], index: 1, kind: input, shape index: {}]   ;;  %s219_s2 = inlined_call_operand.vmem [shape: f32[1,32], index: 2, kind: input, shape index: {}]   ;;  %s220_s3 = inlined_call_operand.vmem [shape: f32[2,32], index: 3, kind: output, shape index: {}]  }
   0x1   :  { %s15_s14 = sshll.u32 %s217_s0, 4  ;;  %s16_s14 = int_to_ptr.hbm [resolvable:$true] %s15_s14 }
   0x2   :  { %9 = vsyncpa [#allocation5], 0  ;;  %s179_s15 = smov [#allocation2]   ;;  %s25_s19 = sshll.u32 %s218_s1, 4  ;;  %s26_s19 = int_to_ptr.hbm [resolvable:$true] %s25_s19 }
   0x3   :  { %s17_s16 = sshll.u32 %s179_s15, 4  ;;  %s180_s20 = smov [#allocation4]   ;;  %s18_s16 = int_to_ptr.vmem [resolvable:$true] %s17_s16 }
   0x4   :  { %20 = dma.hbm_to_vmem [thread:$0]  %s16_s14, 32, %s18_s16, [#allocation3]  }
   0x5   :  { %s27_s21 = sshll.u32 %s180_s20, 4  ;;  %s181_s22 = smov 128   ;;  %s28_s21 = int_to_ptr.vmem [resolvable:$true] %s27_s21 }
   0x6   :  { %s182_s23 = smov 8  }
   0x7   :  { %33 = dma.hbm_to_vmem [thread:$0]  %s26_s19, 512, %s28_s21, [#allocation5], %s181_s22, %s181_s22, %s182_s23  }
   0x8   :  { %175 = dma.done.wait [#allocation3], 32  }
   0x9   :  { %176 = vsyncadd [#allocation3], 4294967264 }
   0xa   :  { %177 = dma.done.wait [#allocation5], 512  }
   0xb   :  { %178 = vsyncadd [#allocation5], 4294966784  ;;  %v44_v0 = vld [vmem:[#allocation2] sm:$0x3]  ;;  %vm46_vm0 = vcmask 254976   ;;  %v80_v4 = vld [vmem:[#allocation4 + $0x10] sm:$0xff] }
   0xc   :  { %v45_v1 = vmul.f32 %v44_v0, %v44_v0  ;;  %v81_v3 = vld [vmem:[#allocation4 + $0x18] sm:$0xff]  ;;  %v79_v5 = vld [vmem:[#allocation4 + $0x8] sm:$0xff]  ;;  %v78_v6 = vld [vmem:[#allocation4] sm:$0xff]  ;;  %vm86_vm7 = vcmask 261120  }
   0xd   :  { %102 = vmatpush.msra.mxu0 %v81_v3  ;;  %v122_v30 = vld [vmem:[%s219_s2] ss:$0 sm:$0xff] }
   0xe   :  { %v47_v2 = vsel %vm46_vm0, %v45_v1, 0.0 }
   0xf   :  { %48 = vadd.xlane.f32.xlu0 %v47_v2  ;;  %103 = vmatpush.msra.mxu0 %v80_v4 }
  0x11   :  { %104 = vmatpush.msra.mxu0 %v79_v5 }
  0x13   :  { %105 = vmatpush.msra.mxu0 %v78_v6 }
  0x82   :  { %v49_v7 = vpop.xlane.xlu0 %48 }
  0x83   :  { %123 = vrsqrt.f32 %v49_v7  ;;  %vm57_vm1 = vcmp.eq.f32.partialorder %v49_v7, inf  ;;  %v60_v15 = vand.u32 2147483648, %v49_v7  ;;  %vm59_vm2 = vcmp.eq.f32.partialorder %v49_v7, 0.0 }
  0x89   :  { %v124_v8 = vpop.eup %123 }
  0x8a   :  { %v51_v9 = vmul.f32 %v124_v8, %v49_v7 }
  0x8c   :  { %v52_v10 = vmul.f32 %v124_v8, %v51_v9 }
  0x8e   :  { %v53_v11 = vmul.f32 0.5, %v52_v10 }
  0x90   :  { %v54_v12 = vsub.f32 1.5, %v53_v11 }
  0x92   :  { %v55_v13 = vmul.f32 %v124_v8, %v54_v12 }
  0x94   :  { %v56_v14 = vmul.f32 %v55_v13, %v49_v7 }
  0x96   :  { %v58_v16 = vsel %vm57_vm1, %v49_v7, %v56_v14 }
  0x97   :  { %v61_v17 = vsel %vm59_vm2, %v60_v15, %v58_v16 }
  0x98   :  { %v62_v18 = vmax.f32 %v61_v17, 1e-12 }
  0x9a   :  { %125 = vrcp.f32 %v62_v18  ;;  %v74_v22 = vand.u32 2147483648, %v62_v18  ;;  %v72_v24 = vand.u32 2147483647, %v62_v18  ;;  %vm68_vm4 = vweird.f32 %v62_v18 }
  0x9c   :  { %v75_v26 = vor.u32 1.1754944e-38, %v74_v22  ;;  %vm73_vm6 = vcmp.eq.f32.partialorder %v72_v24, 8.507059e+37 }
  0xa0   :  { %v126_v19 = vpop.eup %125 }
  0xa1   :  { %v64_v20 = vmul.f32 %v126_v19, %v62_v18  ;;  %vm69_vm3 = vweird.f32 %v126_v19 }
  0xa2   :  { %vm70_vm5 = vmor %vm68_vm4, %vm69_vm3 }
  0xa3   :  { %v65_v21 = vsub.f32 1.0, %v64_v20 }
  0xa5   :  { %v66_v23 = vmul.f32 %v126_v19, %v65_v21 }
  0xa7   :  { %v67_v25 = vadd.f32 %v126_v19, %v66_v23 }
  0xa9   :  { %v71_v27 = vsel %vm70_vm5, %v126_v19, %v67_v25 }
  0xaa   :  { %v76_v28 = vsel %vm73_vm6, %v75_v26, %v71_v27 }
  0xab   :  { %v77_v29 = vmul.f32 %v76_v28, %v44_v0 }
  0xad   :  { %117 = vmatmul.msk.f32.vlgmr.msra.gmra.mxu0 %vm86_vm7, %v77_v29 }
 0x12a   :  { %v107_v31 = vpop.f32.mrf.mxu0 }
 0x12b   :  { %v108_v32 = vadd.f32 %v122_v30, %v107_v31 }
 0x12d   :  { %110 = vst.msk [vmem:[%s220_s3] sm:$0x3] %vm46_vm0, %v108_v32 }
 0x12e   :  { %115 = vsyncpa [#allocation3], 1 }
 0x12f   :  { %116 = vsyncpa [#allocation5], 1 }

</bundles_post_ra>
